<compile_context>
chip_gen: v7x
topology: tpu7x:2x2x1
jax: 0.10.0
libtpu: 0.0.40
codegen_flags: <defaults>
</compile_context>

<pallas_src>
import functools

import jax
import jax.numpy as jnp
import numpy as np
from jax.experimental import pallas as pl
from jax.experimental.pallas import tpu as pltpu

_VMEM_LIMIT = 64 * 1024 * 1024


# ----------------------------------------------------------------------------
# Runtime probe: does pltpu.roll(x, shift=1, axis=1, stride=1, stride_axis=0)
# rotate row i right by (1 + i) (jnp.roll convention)?  If yes we use the
# single strided rotate in the rel-shift; otherwise fall back to the barrel
# shifter.  (Keeps the fallback per the review's "verify before deleting".)
# ----------------------------------------------------------------------------
_STRIDED_ROLL_OK = None


def _strided_roll_semantics_ok():
    global _STRIDED_ROLL_OK
    if _STRIDED_ROLL_OK is not None:
        return _STRIDED_ROLL_OK
    try:
        def probe(x_ref, o_ref):
            o_ref[...] = pltpu.roll(x_ref[...], shift=1, axis=1,
                                    stride=1, stride_axis=0)

        x = jnp.arange(128 * 128, dtype=jnp.float32).reshape(128, 128)
        got = pl.pallas_call(
            probe, out_shape=jax.ShapeDtypeStruct((128, 128), jnp.float32))(x)
        got = np.asarray(jax.block_until_ready(got))
        xn = np.asarray(x)
        want = np.stack([np.roll(xn[i], 1 + i) for i in range(128)])
        _STRIDED_ROLL_OK = bool(np.array_equal(got, want))
    except Exception:  # any lowering / semantics mismatch -> barrel fallback
        _STRIDED_ROLL_OK = False
    return _STRIDED_ROLL_OK


# ----------------------------------------------------------------------------
# Projection kernel: wide bf16 GEMM, output written in per-head slabs so no
# HBM transpose of the activation is needed afterwards.
# ----------------------------------------------------------------------------
def _pick_tile(n):
    for t in (512, 256, 128):
        if n % t == 0:
            return t
    return n


def _proj_split_kernel(x_ref, w_ref, o_ref, *, n_chunks, d_head):
    x16 = x_ref[0].astype(jnp.bfloat16)                       # (TS, D)
    wide = jnp.dot(x16, w_ref[...],
                   preferred_element_type=jnp.float32)        # (TS, H*Dh) f32
    wide = wide.astype(jnp.bfloat16)
    for h in range(n_chunks):                                  # static slices
        o_ref[h, 0] = wide[:, h * d_head:(h + 1) * d_head]


def _project_heads(x, w_t, n_chunks, d_head):
    """x: (B, S, D) f32; w_t: (D, n_chunks*d_head) bf16
    -> (n_chunks, B, S, d_head) bf16."""
    b, s, d = x.shape
    ts = _pick_tile(s)
    return pl.pallas_call(
        functools.partial(_proj_split_kernel, n_chunks=n_chunks, d_head=d_head),
        out_shape=jax.ShapeDtypeStruct((n_chunks, b, s, d_head), jnp.bfloat16),
        grid=(b, s // ts),
        in_specs=[pl.BlockSpec((1, ts, d), lambda i, j: (i, j, 0)),
                  pl.BlockSpec((d, n_chunks * d_head), lambda i, j: (0, 0))],
        out_specs=pl.BlockSpec((n_chunks, 1, ts, d_head),
                               lambda i, j: (0, i, j, 0)),
        compiler_params=pltpu.CompilerParams(
            dimension_semantics=("parallel", "parallel"),
            vmem_limit_bytes=_VMEM_LIMIT),
    )(x, w_t)


# ----------------------------------------------------------------------------
# Exact Transformer-XL _rel_shift on one (Q, K) tile with K == Q.
#   shifted[i, j] = T[i, j]   if j <= i
#                 = 0         if j == i + 1
#                 = T[i+1, j] if j >= i + 2
# where T[i, :] is bd[i, :] circularly right-shifted by (i + 1).
# ----------------------------------------------------------------------------
def _rel_shift_tile(bd, use_strided_roll):
    q, k = bd.shape
    diff = (jax.lax.broadcasted_iota(jnp.int32, (q, k), 1)
            - jax.lax.broadcasted_iota(jnp.int32, (q, k), 0))  # col - row
    if use_strided_roll:
        # one XLU pass: row i rotated right by (1 + i)
        t = pltpu.roll(bd, shift=1, axis=1, stride=1, stride_axis=0)
    else:
        # barrel shifter fallback: log2(Q) constant-shift rolls
        row = jax.lax.broadcasted_iota(jnp.int32, (q, k), 0)
        t = jnp.roll(bd, 1, axis=1)
        bit = 1
        while bit < q:
            t = jnp.where((row & bit) != 0, jnp.roll(t, bit, axis=1), t)
            bit *= 2
    t_up = jnp.roll(t, -1, axis=0)            # t_up[i, :] = t[i + 1, :]
    zero = jnp.zeros((), bd.dtype)
    return jnp.where(diff <= 0, t, jnp.where(diff == 1, zero, t_up))


# ----------------------------------------------------------------------------
# Fused attention kernel: grid = (batch, head); batch "parallel", head is the
# accumulation ("arbitrary") axis.
# ----------------------------------------------------------------------------
def _attn_kernel(q_ref, k_ref, v_ref, rk_ref, rwb_ref, rrb_ref, wo_ref,
                 res_ref, gamma_ref, beta_ref, out_ref, acc_ref,
                 *, scale, eps, use_strided_roll):
    n = pl.program_id(1)
    num_heads = pl.num_programs(1)

    @pl.when(n == 0)
    def _init():
        acc_ref[...] = jnp.zeros_like(acc_ref)

    q = q_ref[0, 0].astype(jnp.float32)       # (Q, Dh)
    k = k_ref[0, 0]                           # (K, Dh) bf16
    v = v_ref[0, 0]                           # (K, Dh) bf16
    rk = rk_ref[0]                            # (R, Dh) bf16
    rwb = rwb_ref[0]                          # (1, Dh) f32
    rrb = rrb_ref[0]                          # (1, Dh) f32

    # fold the 1/sqrt(d_head) scale into the (bias-added) queries
    qw = ((q + rwb) * scale).astype(jnp.bfloat16)
    qr = ((q + rrb) * scale).astype(jnp.bfloat16)

    # BD first (then rel-shift), AC after: fewer live (Q, K) tiles.
    bd = jax.lax.dot_general(qr, rk, (((1,), (1,)), ((), ())),
                             preferred_element_type=jnp.float32)   # (Q, R)
    bd = _rel_shift_tile(bd, use_strided_roll)
    ac = jax.lax.dot_general(qw, k, (((1,), (1,)), ((), ())),
                             preferred_element_type=jnp.float32)   # (Q, K)
    s = ac + bd

    m = jnp.max(s, axis=-1, keepdims=True)
    e = jnp.exp(s - m)
    denom = jnp.sum(e, axis=-1, keepdims=True)
    p = (e * pl.reciprocal(denom, approx=True)).astype(jnp.bfloat16)

    head = jnp.dot(p, v, preferred_element_type=jnp.float32)       # (Q, Dh)
    # per-head (p @ V) @ Wo_head accumulated into a lane-dense (Q, D) buffer
    acc_ref[...] += jnp.dot(head.astype(jnp.bfloat16), wo_ref[0],
                            preferred_element_type=jnp.float32)

    @pl.when(n == num_heads - 1)
    def _finalize():
        y = res_ref[0] + acc_ref[...]                              # residual
        mu = jnp.mean(y, axis=-1, keepdims=True)
        var = jnp.mean((y - mu) ** 2, axis=-1, keepdims=True)
        ynorm = (y - mu) * jax.lax.rsqrt(var + eps)
        out_ref[0] = ynorm * gamma_ref[...] + beta_ref[...]


# ----------------------------------------------------------------------------
# Host-facing wrapper (PyTorch layout: w (qlen, bsz, d_model), r (rlen, d_model))
# ----------------------------------------------------------------------------
def rel_partial_mha_forward(w, r, r_w_bias, r_r_bias, qkv_weight, r_weight,
                            o_weight, ln_gamma, ln_beta, n_head, d_head,
                            layer_norm_eps=1e-5):
    qlen, bsz, d_model = w.shape
    rlen = r.shape[0]
    assert rlen == qlen, "no-mems path requires rlen == qlen == klen"
    N, Dh = n_head, d_head

    use_strided_roll = _strided_roll_semantics_ok()

    # (B, Q, D) f32: used as projection input AND as the residual.
    w_t = jnp.transpose(w, (1, 0, 2)).astype(jnp.float32)

    # weight prep (small, one-time): transposed to (D, out) bf16 for the GEMMs
    wqkv_t = qkv_weight.T.astype(jnp.bfloat16)          # (D, 3*N*Dh)
    wr_t = r_weight.T.astype(jnp.bfloat16)              # (D, N*Dh)
    wo_h = o_weight.T.reshape(N, Dh, d_model).astype(jnp.bfloat16)
    rwb = r_w_bias.reshape(N, 1, Dh).astype(jnp.float32)
    rrb = r_r_bias.reshape(N, 1, Dh).astype(jnp.float32)
    gamma = ln_gamma.reshape(1, d_model).astype(jnp.float32)
    beta = ln_beta.reshape(1, d_model).astype(jnp.float32)

    # projections, written directly in per-head layout (no HBM transpose)
    qkv_h = _project_heads(w_t, wqkv_t, 3 * N, Dh)                 # (3N,B,Q,Dh)
    rk_h = _project_heads(r.reshape(1, rlen, d_model).astype(jnp.float32),
                          wr_t, N, Dh)                             # (N,1,R,Dh)
    rk_h = rk_h.reshape(N, rlen, Dh)

    out_t = pl.pallas_call(
        functools.partial(_attn_kernel,
                          scale=1.0 / (d_head ** 0.5),
                          eps=layer_norm_eps,
                          use_strided_roll=use_strided_roll),
        out_shape=jax.ShapeDtypeStruct((bsz, qlen, d_model), jnp.float32),
        grid=(bsz, N),
        in_specs=[
            pl.BlockSpec((1, 1, qlen, Dh), lambda b, n: (n, b, 0, 0)),          # q
            pl.BlockSpec((1, 1, qlen, Dh), lambda b, n: (N + n, b, 0, 0)),      # k
            pl.BlockSpec((1, 1, qlen, Dh), lambda b, n: (2 * N + n, b, 0, 0)),  # v
            pl.BlockSpec((1, rlen, Dh), lambda b, n: (n, 0, 0)),                # rk
            pl.BlockSpec((1, 1, Dh), lambda b, n: (n, 0, 0)),                   # r_w_bias
            pl.BlockSpec((1, 1, Dh), lambda b, n: (n, 0, 0)),                   # r_r_bias
            pl.BlockSpec((1, Dh, d_model), lambda b, n: (n, 0, 0)),             # Wo head
            pl.BlockSpec((1, qlen, d_model), lambda b, n: (b, 0, 0)),           # residual
            pl.BlockSpec((1, d_model), lambda b, n: (0, 0)),                    # gamma
            pl.BlockSpec((1, d_model), lambda b, n: (0, 0)),                    # beta
        ],
        out_specs=pl.BlockSpec((1, qlen, d_model), lambda b, n: (b, 0, 0)),
        scratch_shapes=[pltpu.VMEM((qlen, d_model), jnp.float32)],
        compiler_params=pltpu.CompilerParams(
            dimension_semantics=("parallel", "arbitrary"),
            vmem_limit_bytes=_VMEM_LIMIT),
    )(qkv_h, qkv_h, qkv_h, rk_h, rwb, rrb, wo_h, w_t, gamma, beta)

    return jnp.transpose(out_t, (1, 0, 2))               # (qlen, bsz, d_model)


# ----------------------------------------------------------------------------
# Plain-JAX reference (faithful transcription of the PyTorch forward,
# post-lnorm, no mask / no mems)
# ----------------------------------------------------------------------------
def _reference_forward(w, r, r_w_bias, r_r_bias, qkv_weight, r_weight,
                       o_weight, ln_gamma, ln_beta, n_head, d_head, eps=1e-5):
    qlen, bsz, d_model = w.shape
    rlen = r.shape[0]
    w_heads = w @ qkv_weight.T
    r_head_k = r @ r_weight.T
    q, k, v = jnp.split(w_heads, 3, axis=-1)
    q = q.reshape(qlen, bsz, n_head, d_head)
    k = k.reshape(qlen, bsz, n_head, d_head)
    v = v.reshape(qlen, bsz, n_head, d_head)
    r_head_k = r_head_k.reshape(rlen, n_head, d_head)
    AC = jnp.einsum('ibnd,jbnd->ijbn', q + r_w_bias, k)
    BD = jnp.einsum('ibnd,jnd->ijbn', q + r_r_bias, r_head_k)
    zp = jnp.zeros((qlen, 1, bsz, n_head), BD.dtype)
    xp = jnp.concatenate([zp, BD], axis=1).reshape(rlen + 1, qlen, bsz, n_head)
    BD = xp[1:].reshape(BD.shape)
    score = (AC + BD) * (1.0 / d_head ** 0.5)
    prob = jax.nn.softmax(score, axis=1)
    av = jnp.einsum('ijbn,jbnd->ibnd', prob, v).reshape(qlen, bsz, n_head * d_head)
    out = av @ o_weight.T
    y = w + out
    mu = y.mean(-1, keepdims=True)
    var = ((y - mu) ** 2).mean(-1, keepdims=True)
    return (y - mu) / jnp.sqrt(var + eps) * ln_gamma + ln_beta


if __name__ == "__main__":
    n_head, d_head, d_model = 2, 16, 32
    qlen = rlen = 128
    bsz = 2

    key = jax.random.PRNGKey(0)
    ks = jax.random.split(key, 9)
    qkv_weight = 0.1 * jax.random.normal(ks[0], (3 * n_head * d_head, d_model), jnp.float32)
    r_weight   = 0.1 * jax.random.normal(ks[1], (n_head * d_head, d_model), jnp.float32)
    o_weight   = 0.2 * jax.random.normal(ks[2], (d_model, n_head * d_head), jnp.float32)
    ln_gamma   = 1.0 + 0.1 * jax.random.normal(ks[3], (d_model,), jnp.float32)
    ln_beta    = 0.1 * jax.random.normal(ks[4], (d_model,), jnp.float32)
    r_w_bias   = 0.3 * jax.random.normal(ks[5], (n_head, d_head), jnp.float32)
    r_r_bias   = 0.3 * jax.random.normal(ks[6], (n_head, d_head), jnp.float32)
    w = jax.random.normal(ks[7], (qlen, bsz, d_model), jnp.float32)
    r = jax.random.normal(ks[8], (rlen, d_model), jnp.float32)

    out = rel_partial_mha_forward(w, r, r_w_bias, r_r_bias, qkv_weight, r_weight,
                                  o_weight, ln_gamma, ln_beta, n_head, d_head)
    out = jax.block_until_ready(out)

    ref = _reference_forward(w, r, r_w_bias, r_r_bias, qkv_weight, r_weight,
                             o_weight, ln_gamma, ln_beta, n_head, d_head)
    np.testing.assert_allclose(np.asarray(out), np.asarray(ref),
                               atol=2e-2, rtol=2e-2)
    print("KERNEL_OK")
</pallas_src>

<mosaic_0001>
module attributes {stable_mosaic.version = 11 : i64} {
  func.func @probe(%arg0: memref<128x128xf32, #tpu.memory_space<vmem>>, %arg1: memref<128x128xf32, #tpu.memory_space<vmem>>) attributes {dimension_semantics = [], scalar_prefetch = 0 : i64, scratch_operands = 0 : i64, tpu.core_type = #tpu.core_type<tc>} {
    %c0 = arith.constant 0 : index
    %c0_0 = arith.constant 0 : index
    %0 = vector.load %arg0[%c0, %c0_0] : memref<128x128xf32, #tpu.memory_space<vmem>>, vector<128x128xf32>
    %c1_i32 = arith.constant 1 : i32
    %1 = tpu.dynamic_rotate %0 by %c1_i32 dim 1 {stride = 1 : si32, stride_dimension = 0 : si32} : vector<128x128xf32>, i32 -> vector<128x128xf32>
    %c0_1 = arith.constant 0 : index
    %c0_2 = arith.constant 0 : index
    %2 = vector.load %arg1[%c0_1, %c0_2] : memref<128x128xf32, #tpu.memory_space<vmem>>, vector<128x128xf32>
    tpu.vector_store %arg1[%c0_1, %c0_2], %1 {strides = array<i32>} : memref<128x128xf32, #tpu.memory_space<vmem>>, vector<128x128xf32>,
    return
  }
}

module attributes {stable_mosaic.version = 11 : i64} {
  func.func @_proj_split_kernel(%arg0: i32, %arg1: i32, %arg2: memref<1x128x32xf32, #tpu.memory_space<vmem>>, %arg3: memref<32x96xbf16, #tpu.memory_space<vmem>>, %arg4: memref<6x1x128x16xbf16, #tpu.memory_space<vmem>>) attributes {dimension_semantics = [#tpu.dimension_semantics<parallel>, #tpu.dimension_semantics<parallel>], iteration_bounds = array<i64: 2, 1>, scalar_prefetch = 0 : i64, scratch_operands = 0 : i64, tpu.core_type = #tpu.core_type<tc>, window_params = [{transform_indices = @transform_0, window_bounds = array<i64: 1, 128, 32>}, {pipeline_mode = #tpu.pipeline_mode<synchronous>, transform_indices = @transform_1, window_bounds = array<i64: 32, 96>}, {transform_indices = @transform_2, window_bounds = array<i64: 6, 1, 128, 16>}]} {
    %c0 = arith.constant 0 : index
    %c0_0 = arith.constant 0 : index
    %c0_1 = arith.constant 0 : index
    %0 = vector.load %arg2[%c0, %c0_0, %c0_1] : memref<1x128x32xf32, #tpu.memory_space<vmem>>, vector<1x128x32xf32>
    %1 = vector.shape_cast %0 : vector<1x128x32xf32> to vector<128x32xf32>
    %2 = arith.truncf %1 : vector<128x32xf32> to vector<128x32xbf16>
    %c0_2 = arith.constant 0 : index
    %c0_3 = arith.constant 0 : index
    %3 = vector.load %arg3[%c0_2, %c0_3] : memref<32x96xbf16, #tpu.memory_space<vmem>>, vector<32x96xbf16>
    %cst = arith.constant dense<0.000000e+00> : vector<128x96xf32>
    %4 = tpu.matmul %2, %3, %cst {dimension_numbers = #tpu.dot_dimension_numbers<[1], [0], [0], [1], [0, 0, 1, 1], [], []>} : vector<128x32xbf16>, vector<32x96xbf16>, vector<128x96xf32> -> vector<128x96xf32>
    %5 = arith.truncf %4 : vector<128x96xf32> to vector<128x96xbf16>
    %6 = vector.extract_strided_slice %5 {offsets = [0, 0], sizes = [128, 16], strides = [1, 1]} : vector<128x96xbf16> to vector<128x16xbf16>
    %c0_4 = arith.constant 0 : index
    %c0_5 = arith.constant 0 : index
    %c0_6 = arith.constant 0 : index
    %c0_7 = arith.constant 0 : index
    %7 = vector.load %arg4[%c0_4, %c0_5, %c0_6, %c0_7] : memref<6x1x128x16xbf16, #tpu.memory_space<vmem>>, vector<1x1x128x16xbf16>
    %8 = vector.shape_cast %7 : vector<1x1x128x16xbf16> to vector<128x16xbf16>
    %9 = vector.shape_cast %6 : vector<128x16xbf16> to vector<1x1x128x16xbf16>
    tpu.vector_store %arg4[%c0_4, %c0_5, %c0_6, %c0_7], %9 {strides = array<i32>} : memref<6x1x128x16xbf16, #tpu.memory_space<vmem>>, vector<1x1x128x16xbf16>,
    %10 = vector.extract_strided_slice %5 {offsets = [0, 16], sizes = [128, 16], strides = [1, 1]} : vector<128x96xbf16> to vector<128x16xbf16>
    %c1 = arith.constant 1 : index
    %c0_8 = arith.constant 0 : index
    %c0_9 = arith.constant 0 : index
    %c0_10 = arith.constant 0 : index
    %11 = vector.load %arg4[%c1, %c0_8, %c0_9, %c0_10] : memref<6x1x128x16xbf16, #tpu.memory_space<vmem>>, vector<1x1x128x16xbf16>
    %12 = vector.shape_cast %11 : vector<1x1x128x16xbf16> to vector<128x16xbf16>
    %13 = vector.shape_cast %10 : vector<128x16xbf16> to vector<1x1x128x16xbf16>
    tpu.vector_store %arg4[%c1, %c0_8, %c0_9, %c0_10], %13 {strides = array<i32>} : memref<6x1x128x16xbf16, #tpu.memory_space<vmem>>, vector<1x1x128x16xbf16>,
    %14 = vector.extract_strided_slice %5 {offsets = [0, 32], sizes = [128, 16], strides = [1, 1]} : vector<128x96xbf16> to vector<128x16xbf16>
    %c2 = arith.constant 2 : index
    %c0_11 = arith.constant 0 : index
    %c0_12 = arith.constant 0 : index
    %c0_13 = arith.constant 0 : index
    %15 = vector.load %arg4[%c2, %c0_11, %c0_12, %c0_13] : memref<6x1x128x16xbf16, #tpu.memory_space<vmem>>, vector<1x1x128x16xbf16>
    %16 = vector.shape_cast %15 : vector<1x1x128x16xbf16> to vector<128x16xbf16>
    %17 = vector.shape_cast %14 : vector<128x16xbf16> to vector<1x1x128x16xbf16>
    tpu.vector_store %arg4[%c2, %c0_11, %c0_12, %c0_13], %17 {strides = array<i32>} : memref<6x1x128x16xbf16, #tpu.memory_space<vmem>>, vector<1x1x128x16xbf16>,
    %18 = vector.extract_strided_slice %5 {offsets = [0, 48], sizes = [128, 16], strides = [1, 1]} : vector<128x96xbf16> to vector<128x16xbf16>
    %c3 = arith.constant 3 : index
    %c0_14 = arith.constant 0 : index
    %c0_15 = arith.constant 0 : index
    %c0_16 = arith.constant 0 : index
    %19 = vector.load %arg4[%c3, %c0_14, %c0_15, %c0_16] : memref<6x1x128x16xbf16, #tpu.memory_space<vmem>>, vector<1x1x128x16xbf16>
    %20 = vector.shape_cast %19 : vector<1x1x128x16xbf16> to vector<128x16xbf16>
    %21 = vector.shape_cast %18 : vector<128x16xbf16> to vector<1x1x128x16xbf16>
    tpu.vector_store %arg4[%c3, %c0_14, %c0_15, %c0_16], %21 {strides = array<i32>} : memref<6x1x128x16xbf16, #tpu.memory_space<vmem>>, vector<1x1x128x16xbf16>,
    %22 = vector.extract_strided_slice %5 {offsets = [0, 64], sizes = [128, 16], strides = [1, 1]} : vector<128x96xbf16> to vector<128x16xbf16>
    %c4 = arith.constant 4 : index
    %c0_17 = arith.constant 0 : index
    %c0_18 = arith.constant 0 : index
    %c0_19 = arith.constant 0 : index
    %23 = vector.load %arg4[%c4, %c0_17, %c0_18, %c0_19] : memref<6x1x128x16xbf16, #tpu.memory_space<vmem>>, vector<1x1x128x16xbf16>
    %24 = vector.shape_cast %23 : vector<1x1x128x16xbf16> to vector<128x16xbf16>
    %25 = vector.shape_cast %22 : vector<128x16xbf16> to vector<1x1x128x16xbf16>
    tpu.vector_store %arg4[%c4, %c0_17, %c0_18, %c0_19], %25 {strides = array<i32>} : memref<6x1x128x16xbf16, #tpu.memory_space<vmem>>, vector<1x1x128x16xbf16>,
    %26 = vector.extract_strided_slice %5 {offsets = [0, 80], sizes = [128, 16], strides = [1, 1]} : vector<128x96xbf16> to vector<128x16xbf16>
    %c5 = arith.constant 5 : index
    %c0_20 = arith.constant 0 : index
    %c0_21 = arith.constant 0 : index
    %c0_22 = arith.constant 0 : index
    %27 = vector.load %arg4[%c5, %c0_20, %c0_21, %c0_22] : memref<6x1x128x16xbf16, #tpu.memory_space<vmem>>, vector<1x1x128x16xbf16>
    %28 = vector.shape_cast %27 : vector<1x1x128x16xbf16> to vector<128x16xbf16>
    %29 = vector.shape_cast %26 : vector<128x16xbf16> to vector<1x1x128x16xbf16>
    tpu.vector_store %arg4[%c5, %c0_20, %c0_21, %c0_22], %29 {strides = array<i32>} : memref<6x1x128x16xbf16, #tpu.memory_space<vmem>>, vector<1x1x128x16xbf16>,
    return
  }
  func.func @transform_0(%arg0: i32, %arg1: i32) -> (i32, i32, i32) {
    %c0_i32 = arith.constant 0 : i32
    %c0_i32_0 = arith.constant 0 : i32
    return %arg0, %arg1, %c0_i32 : i32, i32, i32
  }
  func.func @transform_1(%arg0: i32, %arg1: i32) -> (i32, i32) {
    %c0_i32 = arith.constant 0 : i32
    %c0_i32_0 = arith.constant 0 : i32
    %c0_i32_1 = arith.constant 0 : i32
    return %c0_i32, %c0_i32_0 : i32, i32
  }
  func.func @transform_2(%arg0: i32, %arg1: i32) -> (i32, i32, i32, i32) {
    %c0_i32 = arith.constant 0 : i32
    %c0_i32_0 = arith.constant 0 : i32
    %c0_i32_1 = arith.constant 0 : i32
    return %c0_i32, %arg0, %arg1, %c0_i32_0 : i32, i32, i32, i32
  }
}

</mosaic_0001>

<bundles_post_ra>
// kernel: tpu_custom_call.1
= control target key start
LH: loop header
LB: loop body
LE: loop exit
PB: predicated region body
PF: predicated region fallthrough
CT: control target
= control target key end

     0   :  { %6 = vsyncpa [#allocation3], 0  ;;  %s264_s0 = inlined_call_operand.hbm [shape: f32[128,128], index: 0, kind: input, shape index: {}]   ;;  %s265_s1 = inlined_call_operand.hbm [shape: f32[128,128], index: 1, kind: output, shape index: {}]  }
   0x1   :  { %7 = vsyncpa [#allocation4], 0  ;;  %s204_s6 = smov [#allocation2]   ;;  %s156_s10 = scalar_lea.hbm %s264_s0, 2048 }
   0x2   :  { %s13_s7 = sshll.u32 %s204_s6, 4  ;;  %p157_p0 = scmp.ne.s32.totalorder %s264_s0, %s156_s10  ;;  %s14_s7 = int_to_ptr.vmem [resolvable:$true] %s13_s7 }
   0x3   :  { %p160_p1 = scmp.lt.u32.totalorder %s156_s10, %s264_s0 }
   0x5   :  { %p162_p2 = pnand %p160_p1, %p157_p0 }
   0x7   :  { %165 = shalt.err (!%p162_p2)
}
   0x8   :  { %s166_s15 = scalar_lea.vmem %s14_s7, 2048  ;;  %p171_p4 = scmp.lt.s32.totalorder %s14_s7, %s14_s7 }
   0x9   :  { %p167_p3 = scmp.ne.s32.totalorder %s14_s7, %s166_s15  ;;  %p172_p5 = scmp.lt.s32.totalorder %s166_s15, %s166_s15 }
   0xb   :  { %p173_p6 = por %p172_p5, %p171_p4 }
   0xd   :  { %p174_p7 = pnand %p173_p6, %p167_p3 }
   0xf   :  { %177 = shalt.err (!%p174_p7)
}
  0x10   :  { %s205_s16 = smov 128   ;;  %s206_s17 = smov 8  }
  0x11   :  { %19 = dma.hbm_to_vmem [thread:$0]  %s264_s0, 2048, %s14_s7, [#allocation3], %s205_s16, %s205_s16, %s206_s17  }
  0x12   :  { %200 = dma.done.wait [#allocation3], 2048  }
  0x13   :  { %201 = vsyncadd [#allocation3], 4294965248  ;;  %v25_v0 = vld [vmem:[#allocation2 + $0x10] sm:$0xff]  ;;  %v23_v1 = vld [vmem:[#allocation2] sm:$0xff]  ;;  %s207_s20 = smov 273   ;;  %s208_s21 = smov 257  }
  0x14   :  { %49 = vrot.lane.b32.xlu1 %v25_v0, %s207_s20  ;;  %41 = vrot.lane.b32.xlu0 %v23_v1, %s208_s21  ;;  %v26_v2 = vld [vmem:[#allocation2 + $0x18] sm:$0xff]  ;;  %v24_v3 = vld [vmem:[#allocation2 + $0x8] sm:$0xff]  ;;  %s209_s22 = smov 281   ;;  %s210_s23 = smov 265   ;;  %v27_v5 = vld [vmem:[#allocation2 + $0x20] sm:$0xff] }
  0x15   :  { %v28_v4 = vld [vmem:[#allocation2 + $0x28] sm:$0xff]  ;;  %s211_s24 = smov 297   ;;  %s212_s25 = smov 289   ;;  %v30_v6 = vld [vmem:[#allocation2 + $0x38] sm:$0xff]  ;;  %v29_v7 = vld [vmem:[#allocation2 + $0x30] sm:$0xff] }
  0x16   :  { %s213_s0 = smov 313   ;;  %s214_s26 = smov 305   ;;  %v32_v8 = vld [vmem:[#allocation2 + $0x48] sm:$0xff]  ;;  %v31_v9 = vld [vmem:[#allocation2 + $0x40] sm:$0xff]  ;;  %v34_v10 = vld [vmem:[#allocation2 + $0x58] sm:$0xff] }
  0x17   :  { %s215_s27 = smov 329   ;;  %s216_s28 = smov 321   ;;  %v33_v11 = vld [vmem:[#allocation2 + $0x50] sm:$0xff]  ;;  %v36_v12 = vld [vmem:[#allocation2 + $0x68] sm:$0xff]  ;;  %v35_v13 = vld [vmem:[#allocation2 + $0x60] sm:$0xff] }
  0x18   :  { %53 = vrot.lane.b32.xlu1 %v26_v2, %s209_s22  ;;  %45 = vrot.lane.b32.xlu0 %v24_v3, %s210_s23  ;;  %s217_s29 = smov 345   ;;  %s218_s30 = smov 337   ;;  %v38_v14 = vld [vmem:[#allocation2 + $0x78] sm:$0xff]  ;;  %v37_v15 = vld [vmem:[#allocation2 + $0x70] sm:$0xff] }
  0x19   :  { %s219_s2 = smov 361   ;;  %s220_s3 = smov 353  }
  0x1a   :  { %s221_s4 = smov 377   ;;  %s222_s5 = smov 369  }
  0x1b   :  { %s223_s6 = smov [#allocation5]  }
  0x1c   :  { %61 = vrot.lane.b32.xlu1 %v28_v4, %s211_s24  ;;  %57 = vrot.lane.b32.xlu0 %v27_v5, %s212_s25  ;;  %s124_s7 = sshll.u32 %s223_s6, 4  ;;  %s125_s7 = int_to_ptr.vmem [resolvable:$true] %s124_s7 }
  0x1d   :  { %s178_s8 = scalar_lea.vmem %s125_s7, 2048  ;;  %p183_p9 = scmp.lt.s32.totalorder %s125_s7, %s125_s7 }
  0x1e   :  { %p179_p8 = scmp.ne.s32.totalorder %s125_s7, %s178_s8  ;;  %p184_p10 = scmp.lt.s32.totalorder %s178_s8, %s178_s8 }
  0x20   :  { %69 = vrot.lane.b32.xlu1 %v30_v6, %s213_s0  ;;  %65 = vrot.lane.b32.xlu0 %v29_v7, %s214_s26  ;;  %p185_p11 = por %p184_p10, %p183_p9 }
  0x22   :  { %p186_p12 = pnand %p185_p11, %p179_p8 }
  0x24   :  { %77 = vrot.lane.b32.xlu1 %v32_v8, %s215_s27  ;;  %73 = vrot.lane.b32.xlu0 %v31_v9, %s216_s28 }
  0x28   :  { %85 = vrot.lane.b32.xlu1 %v34_v10, %s217_s29  ;;  %81 = vrot.lane.b32.xlu0 %v33_v11, %s218_s30 }
  0x2c   :  { %93 = vrot.lane.b32.xlu1 %v36_v12, %s219_s2  ;;  %89 = vrot.lane.b32.xlu0 %v35_v13, %s220_s3 }
  0x30   :  { %101 = vrot.lane.b32.xlu1 %v38_v14, %s221_s4  ;;  %97 = vrot.lane.b32.xlu0 %v37_v15, %s222_s5 }
  0x86   :  { %v50_v16 = vpop.permute.xlu1 %49  ;;  %v42_v17 = vpop.permute.xlu0 %41 }
  0x87   :  { %105 = vst [vmem:[#allocation5 + $0x10] sm:$0xff] %v50_v16  ;;  %103 = vst [vmem:[#allocation5] sm:$0xff] %v42_v17 }
  0x8a   :  { %v54_v18 = vpop.permute.xlu1 %53  ;;  %v46_v19 = vpop.permute.xlu0 %45 }
  0x8b   :  { %106 = vst [vmem:[#allocation5 + $0x18] sm:$0xff] %v54_v18  ;;  %104 = vst [vmem:[#allocation5 + $0x8] sm:$0xff] %v46_v19 }
  0x8e   :  { %v62_v20 = vpop.permute.xlu1 %61  ;;  %v58_v21 = vpop.permute.xlu0 %57 }
  0x8f   :  { %108 = vst [vmem:[#allocation5 + $0x28] sm:$0xff] %v62_v20  ;;  %107 = vst [vmem:[#allocation5 + $0x20] sm:$0xff] %v58_v21 }
  0x92   :  { %v70_v22 = vpop.permute.xlu1 %69  ;;  %v66_v23 = vpop.permute.xlu0 %65 }
  0x93   :  { %110 = vst [vmem:[#allocation5 + $0x38] sm:$0xff] %v70_v22  ;;  %109 = vst [vmem:[#allocation5 + $0x30] sm:$0xff] %v66_v23 }
  0x96   :  { %v78_v24 = vpop.permute.xlu1 %77  ;;  %v74_v25 = vpop.permute.xlu0 %73 }
  0x97   :  { %112 = vst [vmem:[#allocation5 + $0x48] sm:$0xff] %v78_v24  ;;  %111 = vst [vmem:[#allocation5 + $0x40] sm:$0xff] %v74_v25 }
  0x9a   :  { %v86_v26 = vpop.permute.xlu1 %85  ;;  %v82_v27 = vpop.permute.xlu0 %81 }
  0x9b   :  { %114 = vst [vmem:[#allocation5 + $0x58] sm:$0xff] %v86_v26  ;;  %113 = vst [vmem:[#allocation5 + $0x50] sm:$0xff] %v82_v27 }
  0x9e   :  { %v94_v28 = vpop.permute.xlu1 %93  ;;  %v90_v29 = vpop.permute.xlu0 %89 }
  0x9f   :  { %116 = vst [vmem:[#allocation5 + $0x68] sm:$0xff] %v94_v28  ;;  %115 = vst [vmem:[#allocation5 + $0x60] sm:$0xff] %v90_v29 }
  0xa2   :  { %v102_v30 = vpop.permute.xlu1 %101  ;;  %v98_v31 = vpop.permute.xlu0 %97 }
  0xa3   :  { %118 = vst [vmem:[#allocation5 + $0x78] sm:$0xff] %v102_v30  ;;  %117 = vst [vmem:[#allocation5 + $0x70] sm:$0xff] %v98_v31 }
  0xa4   :  { %189 = shalt.err (!%p186_p12)
}
  0xa5   :  { %s190_s11 = scalar_lea.hbm %s265_s1, 2048 }
  0xa6   :  { %p191_p13 = scmp.ne.s32.totalorder %s265_s1, %s190_s11  ;;  %p194_p0 = scmp.lt.u32.totalorder %s190_s11, %s265_s1 }
  0xa8   :  { %p196_p1 = pnand %p194_p0, %p191_p13 }
  0xaa   :  { %199 = shalt.err (!%p196_p1)
}
  0xab   :  { %130 = dma.vmem_to_hbm [thread:$0]  %s125_s7, 2048, %s265_s1, [#allocation4], %s205_s16, %s205_s16, %s206_s17  }
  0xac   :  { %202 = dma.done.wait [#allocation4], 2048  }
  0xad   :  { %203 = vsyncadd [#allocation4], 4294965248 }
  0xae   :  { %134 = vsyncpa [#allocation3], 1 }
  0xaf   :  { %135 = vsyncpa [#allocation4], 1 }

// kernel: tpu_custom_call.1
= control target key start
LH: loop header
LB: loop body
LE: loop exit
PB: predicated region body
PF: predicated region fallthrough
CT: control target
= control target key end

     0   :  { %7 = vsyncpa [#allocation3], 0  ;;  %s1950_s0 = inlined_call_operand.hbm [shape: f32[2,128,32], index: 0, kind: input, shape index: {}]   ;;  %s1951_s1 = inlined_call_operand.hbm [shape: bf16[32,96], index: 1, kind: input, shape index: {}]   ;;  %s1952_s2 = inlined_call_operand.hbm [shape: bf16[6,2,128,16], index: 2, kind: output, shape index: {}]  }
   0x1   :  { %9 = vsyncpa [#allocation3 + $0x1], 0 }
   0x2   :  { %10 = vsyncpa [#allocation6], 0 }
   0x3   :  { %11 = vsyncpa [#allocation4], 0 }
   0x4   :  { %13 = vsyncpa [#allocation4 + $0x1], 0  ;;  %s1330_s9 = smov 0   ;;  %s1332_s10 = smov 0  }
   0x5   :  { %s1334_s11 = smov 0   ;;  %s1336_s12 = smov 0  }
   0x6   :  { %s1338_s13 = smov 0   ;;  %s1340_s14 = smov 0  }
   0x7 LB: > { %s908_s15 = sadd.s32 4294967295, %s1295_s14   ;;  %s909_s16 = sadd.s32 4294967294, %s1295_s14   ;;  %s1295_s14 = sphi %s1340_s14, %s19_s14   ;;  %s1291_s13 = sphi %s1338_s13, %s1976_s13   ;;  %s1287_s12 = sphi %s1336_s12, %s1975_s12   ;;  %s1283_s11 = sphi %s1334_s11, %s1974_s11   ;;  %s1279_s10 = sphi %s1332_s10, %s1973_s10   ;;  %s1275_s9 = sphi %s1330_s9, %s1972_s9  }
   0x8   : > { %p53_p0 = scmp.ne.s32.totalorder %s1279_s10, %s1275_s9  ;;  %p1364_p1 = scmp.eq.s32.totalorder %s908_s15, 0 }
   0x9   : > { %p1368_p2 = scmp.eq.s32.totalorder %s908_s15, 1  ;;  %p106_p3 = scmp.eq.s32.totalorder %s909_s16, 1 }
   0xa   : > { %s1957_s17 = scalar_select %p1364_p1, 1, 0 }
   0xb   : > { %s1958_s18 = scalar_select %p1368_p2, 1, 0 }
   0xc   : > { %p1374_p4 = por %p1364_p1, %p53_p0  ;;  %p910_p5 = scmp.ge.s32.totalorder %s1295_s14, 1 }
   0xd   : > { %p1379_p6 = por %p106_p3, %p53_p0  ;;  %p113_p7 = scmp.lt.s32.totalorder %s1295_s14, 3 }
   0xe   : > { %s1959_s19 = scalar_select %p1374_p4, 1, 0 }
   0xf   : > { %s1960_s20 = scalar_select %p1379_p6, 1, 0 }
  0x10   : > { %p1384_p8 = pnand %p910_p5, %p113_p7  ;;  %s1297_s22 = smov [#allocation5]  }
  0x11   : > { %s125_s23 = sshll.u32 %s1297_s22, 4  ;;  %s31_s25 = sadd.s32 1, %s1291_s13  ;;  %s126_s23 = int_to_ptr.vmem [resolvable:$true] %s125_s23 }
  0x12   : > { %s1961_s21 = scalar_select %p1384_p8, 1, 0 }
  0x13   : > { %p1096_p9 = pneg %p1384_p8  ;;  %s1179_s28 = scalar_lea.hbm %s1951_s1, 256 }
  0x14   : > { %p1180_p12 = scmp.ne.s32.totalorder %s1951_s1, %s1179_s28  ;;  %p1186_p5 = scmp.lt.u32.totalorder %s1179_s28, %s1951_s1 }
  0x15   : > { %p1393_p11 = pnand %p1096_p9, %p1364_p1 }
  0x17   : > { %p1181_p13 = pneg %p1393_p11 }
  0x19   : > { %p1182_p0 = pnand %p1181_p13, %p1180_p12 }
  0x1b   : > { %p1183_p3 = pneg %p1182_p0 }
  0x1d   : > { %p1188_p7 = pnand %p1186_p5, %p1183_p3 }
  0x1f   : > { %1191 = shalt.err (!%p1188_p7)
}
  0x20   : > { %s1192_s5 = scalar_lea.vmem %s126_s23, 256  ;;  %p1200_p1 = scmp.lt.s32.totalorder %s126_s23, %s126_s23 }
  0x21   : > { %p1193_p9 = scmp.ne.s32.totalorder %s126_s23, %s1192_s5  ;;  %p1201_p4 = scmp.lt.s32.totalorder %s1192_s5, %s1192_s5 }
  0x23   : > { %p1195_p10 = pnand %p1193_p9, %p1181_p13  ;;  %p1202_p8 = por %p1201_p4, %p1200_p1 }
  0x25   : > { %p1196_p6 = pneg %p1195_p10 }
  0x27   : > { %p1203_p2 = pnand %p1202_p8, %p1196_p6 }
  0x29   : > { %1206 = shalt.err (!%p1203_p2)
}
  0x2a   : > { %s1298_s6 = smov 64   ;;  %s1299_s7 = smov 4  }
  0x2b   : > { %1099 = dma.hbm_to_vmem [thread:$0]  (!%p1393_p11), %s1951_s1, 256, %s126_s23, [#allocation6], %s1298_s6, %s1298_s6, %s1299_s7  }
  0x2c   : > { %p33_p1 = scmp.ge.s32.totalorder %s31_s25, 2  ;;  %s40_s16 = sadd.s32 1, %s1283_s11 }
  0x2d   : > { %p47_p2 = scmp.ne.s32.totalorder %s1283_s11, %s1279_s10  ;;  %p48_p4 = scmp.eq.s32.totalorder %s1295_s14, 0 }
  0x2e   : > { %s1978_s25 = smov (%p33_p1, %s31_s25), 0  ;;  %p1964_p8 = scmp.ne.s32.totalorder %s1958_s18, 0 }
  0x2f   : > { %p1420_p6 = por %p48_p4, %p47_p2  ;;  %s35_s24 = ssub.s32 %s1291_s13, %s1978_s25 }
  0x30   : > { %p1426_p10 = por %p1964_p8, %p47_p2  ;;  %p1109_p12 = scmp.lt.s32.totalorder %s1295_s14, 2 }
  0x31   : > { %p38_p11 = scmp.eq.s32.totalorder %s35_s24, 0  ;;  %s139_s23 = sand.u32 1, %s1283_s11  }
  0x32   : > { %s913_s27 = sshll.u32 %s139_s23, 7  ;;  %s1029_s29 = sshll.u32 %s1291_s13, 11 }
  0x33   : > { %s1435_s28 = scalar_select %p38_p11, %s1283_s11, %s40_s16  }
  0x34   : > { %s1441_s4 = scalar_lea.hbm %s1950_s0, %s1029_s29  ;;  %s143_s18 = scalar_lea.vmem [#allocation2], %s913_s27 }
  0x35   : > { %s152_s5 = sshll.u32 %s143_s18, 4  ;;  %p1447_p13 = pnand %p1109_p12, %p1420_p6  ;;  %s1443_s5 = int_to_ptr.vmem [resolvable:$true] %s152_s5 }
  0x36   : > { %s1451_s7 = scalar_lea.sflag [#allocation3], %s139_s23  ;;  %s1207_s8 = scalar_lea.hbm %s1441_s4, 2048 }
  0x37   : > { %p1208_p0 = scmp.ne.s32.totalorder %s1441_s4, %s1207_s8  ;;  %p1209_p3 = pneg %p1447_p13 }
  0x38   : > { %s1212_s22 = scalar_lea.hbm %s1950_s0, 4096  ;;  %p1213_p9 = scmp.lt.u32.totalorder %s1441_s4, %s1950_s0 }
  0x39   : > { %p1210_p5 = pnand %p1209_p3, %p1208_p0  ;;  %p1214_p1 = scmp.lt.u32.totalorder %s1212_s22, %s1207_s8 }
  0x3a   : > { %p1216_p4 = scmp.lt.u32.totalorder %s1207_s8, %s1441_s4 }
  0x3b   : > { %p1211_p7 = pneg %p1210_p5  ;;  %p1215_p2 = por %p1214_p1, %p1213_p9 }
  0x3d   : > { %p1217_p6 = por %p1216_p4, %p1215_p2 }
  0x3f   : > { %p1218_p8 = pnand %p1217_p6, %p1211_p7 }
  0x41   : > { %1221 = shalt.err (!%p1218_p8)
}
  0x42   : > { %s1222_s23 = scalar_lea.vmem %s1443_s5, 2048  ;;  %s1300_s29 = smov [#allocation2]  }
  0x43   : > { %p1223_p12 = scmp.ne.s32.totalorder %s1443_s5, %s1222_s23  ;;  %s1227_s30 = sshll.u32 %s1300_s29, 4  ;;  %s1228_s30 = int_to_ptr.vmem [resolvable:$false] %s1227_s30 }
  0x44   : > { %s1229_s3 = scalar_lea.vmem %s1228_s30, 4096  ;;  %p1230_p5 = scmp.lt.s32.totalorder %s1443_s5, %s1228_s30 }
  0x45   : > { %p1225_p11 = pnand %p1223_p12, %p1209_p3  ;;  %p1231_p9 = scmp.lt.s32.totalorder %s1229_s3, %s1222_s23 }
  0x47   : > { %p1226_p0 = pneg %p1225_p11  ;;  %p1232_p1 = por %p1231_p9, %p1230_p5 }
  0x49   : > { %p1233_p2 = pnand %p1232_p1, %p1226_p0 }
  0x4b   : > { %1236 = shalt.err (!%p1233_p2)
}
  0x4c   : > { %s1301_s18 = smov 128   ;;  %s1302_s8 = smov 8  }
  0x4d   : > { %1103 = dma.hbm_to_vmem [thread:$0]  (!%p1447_p13), %s1441_s4, 2048, %s1443_s5, %s1451_s7, %s1301_s18, %s1301_s18, %s1302_s8  }
  0x4e   : > { %p1967_p3 = scmp.ne.s32.totalorder %s1961_s21, 0 }
  0x4f   : > { %s1482_s15 = sand.u32 (!%p1967_p3), 1, %s1279_s10   ;;  %p1968_p7 = scmp.ne.s32.totalorder (!%p1967_p3), %s1959_s19, 0 }
  0x50   : > { %164 = sbr.rel (%p1967_p3) target bundleno = 595 (0x253), region = 28  ;;  %s917_s16 = sshll.u32 (!%p1967_p3), %s1482_s15, 7 }
  0x51   : > { %s167_s22 = scalar_lea.sflag (!%p1967_p3), [#allocation3], %s1482_s15  ;;  %s1486_s24 = scalar_lea.vmem (!%p1967_p3), [#allocation2], %s917_s16 }
  0x57   : > { %1262 = dma.done.wait (%p1968_p7), %s167_s22, 2048  }
  0x58   : > { %1264 = vsyncadd (%p1968_p7), %s167_s22, 4294965248  ;;  %p1969_p13 = scmp.ne.s32.totalorder %s1957_s17, 0 }
  0x5a   : > { %1266 = dma.done.wait (%p1969_p13), [#allocation6], 256  }
  0x5b   : > { %1268 = vsyncadd (%p1969_p13), [#allocation6], 4294967040  ;;  %v1177_v0 = vld [vmem:[#allocation5] sm:$0xff]   ;;  %v1178_v1 = vld [vmem:[#allocation5 + $0x8] sm:$0xff]   ;;  %vm238_vm0 = vcmask 261120   ;;  %s1081_s17 = smul.u32 384, %s1482_s15 }
  0x5c   : > { %1057 = vmatprep.subr.bf16.mxu0 %v1177_v0  ;;  %1077 = vmatprep.subr.bf16.mxu1 %v1177_v0  ;;  %v198_v2 = vld [vmem:[%s1486_s24] sm:$0xff]  ;;  %v199_v3 = vld [vmem:[%s1486_s24 + $0x8] sm:$0xff]  ;;  %v200_v7 = vld [vmem:[%s1486_s24 + $0x10] sm:$0xff]  ;;  %vm424_vm1 = vcmask 125952   ;;  %s1303_s21 = smov 112   ;;  %s1304_s4 = smov 96  }
  0x5d   : > { %v206_v4 = vld [vmem:[%s1486_s24 + $0x40] sm:$0xff]  ;;  %1058 = vmatpush3.bf16.msra.mxu0 %v1177_v0  ;;  %1079 = vmatpush3.bf16.msra.mxu1 %v1177_v0  ;;  %v214_v5 = vpack.c.bf16 %v199_v3, %v198_v2  ;;  %v207_v6 = vld [vmem:[%s1486_s24 + $0x48] sm:$0xff]  ;;  %v201_v8 = vld [vmem:[%s1486_s24 + $0x18] sm:$0xff]  ;;  %s1529_s19 = scalar_lea.vmem [#allocation7], %s1081_s17  ;;  %s1305_s5 = smov 80  }
  0x5e   : > { %1059 = vmatprep.subr.bf16.mxu0 %v1178_v1  ;;  %1078 = vmatprep.subr.bf16.mxu1 %v1178_v1  ;;  %v218_v9 = vpack.c.bf16 %v207_v6, %v206_v4  ;;  %v208_v10 = vld [vmem:[%s1486_s24 + $0x50] sm:$0xff]  ;;  %v209_v11 = vld [vmem:[%s1486_s24 + $0x58] sm:$0xff]  ;;  %v202_v12 = vld [vmem:[%s1486_s24 + $0x20] sm:$0xff]  ;;  %v215_v14 = vpack.c.bf16 %v201_v8, %v200_v7  ;;  %s1306_s6 = smov 64   ;;  %s1307_s7 = smov 48  }
  0x5f   : > { %1061 = vmatprep.mubr.msk.bf16.mxu0 %vm238_vm0, %v214_v5  ;;  %v203_v13 = vld [vmem:[%s1486_s24 + $0x28] sm:$0xff]  ;;  %v219_v15 = vpack.c.bf16 %v209_v11, %v208_v10  ;;  %v210_v16 = vld [vmem:[%s1486_s24 + $0x60] sm:$0xff]  ;;  %v204_v20 = vld [vmem:[%s1486_s24 + $0x30] sm:$0xff]  ;;  %s767_s27 = scalar_lea.sflag [#allocation4], %s1482_s15 }
  0x60   : > { %1069 = vmatprep.mubr.msk.bf16.mxu1 %vm238_vm0, %v218_v9  ;;  %v211_v17 = vld [vmem:[%s1486_s24 + $0x68] sm:$0xff]  ;;  %v216_v18 = vpack.c.bf16 %v203_v13, %v202_v12  ;;  %v205_v21 = vld [vmem:[%s1486_s24 + $0x38] sm:$0xff]  ;;  %v212_v22 = vld [vmem:[%s1486_s24 + $0x70] sm:$0xff] }
  0x61   : > { %1060 = vmatpush3.bf16.msra.mxu0 %v1178_v1  ;;  %1080 = vmatpush3.bf16.msra.mxu1 %v1178_v1  ;;  %v220_v19 = vpack.c.bf16 %v211_v17, %v210_v16  ;;  %v213_v23 = vld [vmem:[%s1486_s24 + $0x78] sm:$0xff]  ;;  %v217_v24 = vpack.c.bf16 %v205_v21, %v204_v20 }
  0x62   : > { %v221_v25 = vpack.c.bf16 %v213_v23, %v212_v22 }
  0x64   : > { %1062 = vmatmul.mubr.msk.bf16.vlgmr.msra.gmra.mrb[0].mxu0 %vm238_vm0, %v215_v14  ;;  %1070 = vmatmul.mubr.msk.bf16.vlgmr.msra.gmra.mrb[0].mxu1 %vm238_vm0, %v219_v15 }
  0x65   : > { %1065 = vmatprep.mubr.msk.bf16.mxu0 %vm238_vm0, %v216_v18  ;;  %1073 = vmatprep.mubr.msk.bf16.mxu1 %vm238_vm0, %v220_v19 }
  0x6c   : > { %1066 = vmatmul.mubr.msk.bf16.gmra.mrb[4].mxu0 %vm238_vm0, %v217_v24  ;;  %1074 = vmatmul.mubr.msk.bf16.gmra.mrb[4].mxu1 %vm238_vm0, %v221_v25 }
 0x137   : > { %v1063_v26 = vpop.f32.mrb[0].mxu0  ;;  %v1071_v27 = vpop.f32.mrb[0].mxu1 }
 0x138   : > { %v1521_v28 = vpack.c.bf16 %v1063_v26, %v1063_v26  ;;  %v1523_v29 = vpack.c.bf16 %v1071_v27, %v1071_v27  ;;  %v297_v30 = vpop.f32.mrb[1].mxu0  ;;  %v329_v31 = vpop.f32.mrb[1].mxu1 }
 0x139   : > { %v1525_v32 = vpack.c.bf16 %v297_v30, %v297_v30  ;;  %v1527_v33 = vpack.c.bf16 %v329_v31, %v329_v31  ;;  %v1064_v34 = vpop.f32.mrb[2].mxu0  ;;  %v1072_v35 = vpop.f32.mrb[2].mxu1 }
 0x13a   : > { %427 = vst.msk [vmem:[%s1529_s19 + $0x8] sm:$0xf] %vm424_vm1, %v1521_v28  ;;  %435 = vst.msk [vmem:[%s1529_s19 + $0x28] sm:$0xf] %vm424_vm1, %v1523_v29  ;;  %v1033_v36 = vpack.c.bf16 %v1064_v34, %v1064_v34  ;;  %v1041_v37 = vpack.c.bf16 %v1072_v35, %v1072_v35  ;;  %461 = vrot.lane.b32.xlu0 %v1523_v29, %s1303_s21  ;;  %v332_v38 = vpop.f32.mrb[3].mxu1  ;;  %445 = vrot.lane.b32.xlu1 %v1521_v28, %s1303_s21  ;;  %v300_v39 = vpop.f32.mrb[3].mxu0 }
 0x13b   : > { %425 = vst.msk [vmem:[%s1529_s19] sm:$0xf] %vm424_vm1, %v1525_v32  ;;  %433 = vst.msk [vmem:[%s1529_s19 + $0x20] sm:$0xf] %vm424_vm1, %v1527_v33  ;;  %v1547_v40 = vpack.c.bf16 %v332_v38, %v332_v38  ;;  %v1549_v41 = vpack.c.bf16 %v300_v39, %v300_v39 }
 0x13c   : > { %428 = vst.msk [vmem:[%s1529_s19 + $0xc] sm:$0xf] %vm424_vm1, %v1033_v36  ;;  %436 = vst.msk [vmem:[%s1529_s19 + $0x2c] sm:$0xf] %vm424_vm1, %v1041_v37 }
 0x13d   : > { %434 = vst.msk [vmem:[%s1529_s19 + $0x24] sm:$0xf] %vm424_vm1, %v1547_v40  ;;  %426 = vst.msk [vmem:[%s1529_s19 + $0x4] sm:$0xf] %vm424_vm1, %v1549_v41 }
 0x13e   : > { %510 = vrot.lane.b32.xlu0 %v1521_v28, %s1304_s4  ;;  %447 = vrot.lane.b32.xlu1 %v1033_v36, %s1303_s21 }
 0x13f   : > { %v1067_v42 = vpop.f32.mrb[4].mxu0  ;;  %v1075_v43 = vpop.f32.mrb[4].mxu1 }
 0x140   : > { %v1564_v44 = vpack.c.bf16 %v1067_v42, %v1067_v42  ;;  %v313_v45 = vpop.f32.mrb[5].mxu0  ;;  %v1566_v46 = vpack.c.bf16 %v1075_v43, %v1075_v43  ;;  %v345_v47 = vpop.f32.mrb[5].mxu1 }
 0x141   : > { %v1568_v48 = vpack.c.bf16 %v313_v45, %v313_v45  ;;  %v1068_v49 = vpop.f32.mrb[6].mxu0  ;;  %v1570_v50 = vpack.c.bf16 %v345_v47, %v345_v47  ;;  %v1076_v51 = vpop.f32.mrb[6].mxu1 }
 0x142   : > { %526 = vrot.lane.b32.xlu0 %v1523_v29, %s1304_s4  ;;  %463 = vrot.lane.b32.xlu1 %v1041_v37, %s1303_s21  ;;  %431 = vst.msk [vmem:[%s1529_s19 + $0x18] sm:$0xf] %vm424_vm1, %v1564_v44  ;;  %v1578_v52 = vpack.c.bf16 %v1068_v49, %v1068_v49  ;;  %v316_v53 = vpop.f32.mrb[7].mxu0  ;;  %439 = vst.msk [vmem:[%s1529_s19 + $0x38] sm:$0xf] %vm424_vm1, %v1566_v46  ;;  %v1583_v54 = vpack.c.bf16 %v1076_v51, %v1076_v51  ;;  %v348_v55 = vpop.f32.mrb[7].mxu1 }
 0x143   : > { %429 = vst.msk [vmem:[%s1529_s19 + $0x10] sm:$0xf] %vm424_vm1, %v1568_v48  ;;  %v1588_v56 = vpack.c.bf16 %v316_v53, %v316_v53  ;;  %437 = vst.msk [vmem:[%s1529_s19 + $0x30] sm:$0xf] %vm424_vm1, %v1570_v50  ;;  %v1593_v57 = vpack.c.bf16 %v348_v55, %v348_v55 }
 0x144   : > { %432 = vst.msk [vmem:[%s1529_s19 + $0x1c] sm:$0xf] %vm424_vm1, %v1578_v52  ;;  %440 = vst.msk [vmem:[%s1529_s19 + $0x3c] sm:$0xf] %vm424_vm1, %v1583_v54 }
 0x145   : > { %430 = vst.msk [vmem:[%s1529_s19 + $0x14] sm:$0xf] %vm424_vm1, %v1588_v56  ;;  %438 = vst.msk [vmem:[%s1529_s19 + $0x34] sm:$0xf] %vm424_vm1, %v1593_v57 }
 0x146   : > { %575 = vrot.lane.b32.xlu0 %v1521_v28, %s1305_s5  ;;  %512 = vrot.lane.b32.xlu1 %v1033_v36, %s1304_s4 }
 0x14a   : > { %591 = vrot.lane.b32.xlu0 %v1523_v29, %s1305_s5  ;;  %528 = vrot.lane.b32.xlu1 %v1041_v37, %s1304_s4 }
 0x14e   : > { %640 = vrot.lane.b32.xlu0 %v1521_v28, %s1306_s6  ;;  %577 = vrot.lane.b32.xlu1 %v1033_v36, %s1305_s5 }
 0x152   : > { %656 = vrot.lane.b32.xlu0 %v1523_v29, %s1306_s6  ;;  %593 = vrot.lane.b32.xlu1 %v1041_v37, %s1305_s5 }
 0x156   : > { %705 = vrot.lane.b32.xlu0 %v1521_v28, %s1307_s7  ;;  %642 = vrot.lane.b32.xlu1 %v1033_v36, %s1306_s6 }
 0x15a   : > { %721 = vrot.lane.b32.xlu0 %v1523_v29, %s1307_s7  ;;  %658 = vrot.lane.b32.xlu1 %v1041_v37, %s1306_s6 }
 0x15e   : > { %441 = vrot.lane.b32.xlu0 %v1525_v32, %s1303_s21  ;;  %707 = vrot.lane.b32.xlu1 %v1033_v36, %s1307_s7 }
 0x162   : > { %457 = vrot.lane.b32.xlu0 %v1527_v33, %s1303_s21  ;;  %723 = vrot.lane.b32.xlu1 %v1041_v37, %s1307_s7 }
 0x166   : > { %506 = vrot.lane.b32.xlu0 %v1525_v32, %s1304_s4  ;;  %459 = vrot.lane.b32.xlu1 %v1547_v40, %s1303_s21 }
 0x16a   : > { %522 = vrot.lane.b32.xlu0 %v1527_v33, %s1304_s4  ;;  %508 = vrot.lane.b32.xlu1 %v1549_v41, %s1304_s4 }
 0x16e   : > { %571 = vrot.lane.b32.xlu0 %v1525_v32, %s1305_s5  ;;  %524 = vrot.lane.b32.xlu1 %v1547_v40, %s1304_s4 }
 0x172   : > { %587 = vrot.lane.b32.xlu0 %v1527_v33, %s1305_s5  ;;  %573 = vrot.lane.b32.xlu1 %v1549_v41, %s1305_s5 }
 0x176   : > { %636 = vrot.lane.b32.xlu0 %v1525_v32, %s1306_s6  ;;  %589 = vrot.lane.b32.xlu1 %v1547_v40, %s1305_s5 }
 0x17a   : > { %652 = vrot.lane.b32.xlu0 %v1527_v33, %s1306_s6  ;;  %638 = vrot.lane.b32.xlu1 %v1549_v41, %s1306_s6 }
 0x17e   : > { %701 = vrot.lane.b32.xlu0 %v1525_v32, %s1307_s7  ;;  %654 = vrot.lane.b32.xlu1 %v1547_v40, %s1306_s6 }
 0x182   : > { %717 = vrot.lane.b32.xlu0 %v1527_v33, %s1307_s7  ;;  %703 = vrot.lane.b32.xlu1 %v1549_v41, %s1307_s7 }
 0x186   : > { %719 = vrot.lane.b32.xlu1 %v1547_v40, %s1307_s7  ;;  %443 = vrot.lane.b32.xlu0 %v1549_v41, %s1303_s21 }
 0x18a   : > { %453 = vrot.lane.b32.xlu0 %v1564_v44, %s1303_s21  ;;  %455 = vrot.lane.b32.xlu1 %v1578_v52, %s1303_s21 }
 0x18e   : > { %469 = vrot.lane.b32.xlu0 %v1566_v46, %s1303_s21  ;;  %471 = vrot.lane.b32.xlu1 %v1583_v54, %s1303_s21 }
 0x192   : > { %518 = vrot.lane.b32.xlu0 %v1564_v44, %s1304_s4  ;;  %520 = vrot.lane.b32.xlu1 %v1578_v52, %s1304_s4 }
 0x196   : > { %534 = vrot.lane.b32.xlu0 %v1566_v46, %s1304_s4  ;;  %536 = vrot.lane.b32.xlu1 %v1583_v54, %s1304_s4 }
 0x19a   : > { %583 = vrot.lane.b32.xlu0 %v1564_v44, %s1305_s5  ;;  %585 = vrot.lane.b32.xlu1 %v1578_v52, %s1305_s5 }
 0x19e   : > { %599 = vrot.lane.b32.xlu0 %v1566_v46, %s1305_s5  ;;  %601 = vrot.lane.b32.xlu1 %v1583_v54, %s1305_s5 }
 0x1a2   : > { %648 = vrot.lane.b32.xlu0 %v1564_v44, %s1306_s6  ;;  %650 = vrot.lane.b32.xlu1 %v1578_v52, %s1306_s6 }
 0x1a6   : > { %664 = vrot.lane.b32.xlu0 %v1566_v46, %s1306_s6  ;;  %666 = vrot.lane.b32.xlu1 %v1583_v54, %s1306_s6 }
 0x1aa   : > { %713 = vrot.lane.b32.xlu0 %v1564_v44, %s1307_s7  ;;  %715 = vrot.lane.b32.xlu1 %v1578_v52, %s1307_s7 }
 0x1ac   : > { %v462_v58 = vpop.permute.xlu0 %461  ;;  %v446_v59 = vpop.permute.xlu1 %445 }
 0x1ad   : > { %955 = vst.msk [vmem:[%s1529_s19 + $0x68] sm:$0xf] %vm424_vm1, %v462_v58  ;;  %947 = vst.msk [vmem:[%s1529_s19 + $0x48] sm:$0xf] %vm424_vm1, %v446_v59 }
 0x1ae   : > { %449 = vrot.lane.b32.xlu0 %v1568_v48, %s1303_s21  ;;  %451 = vrot.lane.b32.xlu1 %v1588_v56, %s1303_s21 }
 0x1b0   : > { %v511_v60 = vpop.permute.xlu0 %510  ;;  %v448_v61 = vpop.permute.xlu1 %447 }
 0x1b1   : > { %963 = vst.msk [vmem:[%s1529_s19 + $0x88] sm:$0xf] %vm424_vm1, %v511_v60  ;;  %948 = vst.msk [vmem:[%s1529_s19 + $0x4c] sm:$0xf] %vm424_vm1, %v448_v61 }
 0x1b2   : > { %465 = vrot.lane.b32.xlu0 %v1570_v50, %s1303_s21  ;;  %467 = vrot.lane.b32.xlu1 %v1593_v57, %s1303_s21 }
 0x1b4   : > { %v527_v62 = vpop.permute.xlu0 %526  ;;  %v464_v63 = vpop.permute.xlu1 %463 }
 0x1b5   : > { %971 = vst.msk [vmem:[%s1529_s19 + $0xa8] sm:$0xf] %vm424_vm1, %v527_v62  ;;  %956 = vst.msk [vmem:[%s1529_s19 + $0x6c] sm:$0xf] %vm424_vm1, %v464_v63 }
 0x1b6   : > { %514 = vrot.lane.b32.xlu0 %v1568_v48, %s1304_s4  ;;  %516 = vrot.lane.b32.xlu1 %v1588_v56, %s1304_s4 }
 0x1b8   : > { %v576_v0 = vpop.permute.xlu0 %575  ;;  %v513_v1 = vpop.permute.xlu1 %512 }
 0x1b9   : > { %979 = vst.msk [vmem:[%s1529_s19 + $0xc8] sm:$0xf] %vm424_vm1, %v576_v0  ;;  %964 = vst.msk [vmem:[%s1529_s19 + $0x8c] sm:$0xf] %vm424_vm1, %v513_v1 }
 0x1ba   : > { %530 = vrot.lane.b32.xlu0 %v1570_v50, %s1304_s4  ;;  %532 = vrot.lane.b32.xlu1 %v1593_v57, %s1304_s4 }
 0x1bc   : > { %v592_v2 = vpop.permute.xlu0 %591  ;;  %v529_v3 = vpop.permute.xlu1 %528 }
 0x1bd   : > { %987 = vst.msk [vmem:[%s1529_s19 + $0xe8] sm:$0xf] %vm424_vm1, %v592_v2  ;;  %972 = vst.msk [vmem:[%s1529_s19 + $0xac] sm:$0xf] %vm424_vm1, %v529_v3 }
 0x1be   : > { %579 = vrot.lane.b32.xlu0 %v1568_v48, %s1305_s5  ;;  %581 = vrot.lane.b32.xlu1 %v1588_v56, %s1305_s5 }
 0x1c0   : > { %v641_v4 = vpop.permute.xlu0 %640  ;;  %v578_v5 = vpop.permute.xlu1 %577 }
 0x1c1   : > { %995 = vst.msk [vmem:[%s1529_s19 + $0x108] sm:$0xf] %vm424_vm1, %v641_v4  ;;  %980 = vst.msk [vmem:[%s1529_s19 + $0xcc] sm:$0xf] %vm424_vm1, %v578_v5 }
 0x1c2   : > { %595 = vrot.lane.b32.xlu0 %v1570_v50, %s1305_s5  ;;  %597 = vrot.lane.b32.xlu1 %v1593_v57, %s1305_s5 }
 0x1c4   : > { %v657_v6 = vpop.permute.xlu0 %656  ;;  %v594_v7 = vpop.permute.xlu1 %593 }
 0x1c5   : > { %1003 = vst.msk [vmem:[%s1529_s19 + $0x128] sm:$0xf] %vm424_vm1, %v657_v6  ;;  %988 = vst.msk [vmem:[%s1529_s19 + $0xec] sm:$0xf] %vm424_vm1, %v594_v7 }
 0x1c6   : > { %644 = vrot.lane.b32.xlu0 %v1568_v48, %s1306_s6  ;;  %646 = vrot.lane.b32.xlu1 %v1588_v56, %s1306_s6 }
 0x1c8   : > { %v706_v8 = vpop.permute.xlu0 %705  ;;  %v643_v9 = vpop.permute.xlu1 %642 }
 0x1c9   : > { %1011 = vst.msk [vmem:[%s1529_s19 + $0x148] sm:$0xf] %vm424_vm1, %v706_v8  ;;  %996 = vst.msk [vmem:[%s1529_s19 + $0x10c] sm:$0xf] %vm424_vm1, %v643_v9 }
 0x1ca   : > { %660 = vrot.lane.b32.xlu0 %v1570_v50, %s1306_s6  ;;  %662 = vrot.lane.b32.xlu1 %v1593_v57, %s1306_s6 }
 0x1cc   : > { %v722_v10 = vpop.permute.xlu0 %721  ;;  %v659_v11 = vpop.permute.xlu1 %658 }
 0x1cd   : > { %1019 = vst.msk [vmem:[%s1529_s19 + $0x168] sm:$0xf] %vm424_vm1, %v722_v10  ;;  %1004 = vst.msk [vmem:[%s1529_s19 + $0x12c] sm:$0xf] %vm424_vm1, %v659_v11 }
 0x1ce   : > { %709 = vrot.lane.b32.xlu0 %v1568_v48, %s1307_s7  ;;  %711 = vrot.lane.b32.xlu1 %v1588_v56, %s1307_s7 }
 0x1d0   : > { %v442_v12 = vpop.permute.xlu0 %441  ;;  %v708_v13 = vpop.permute.xlu1 %707 }
 0x1d1   : > { %945 = vst.msk [vmem:[%s1529_s19 + $0x40] sm:$0xf] %vm424_vm1, %v442_v12  ;;  %1012 = vst.msk [vmem:[%s1529_s19 + $0x14c] sm:$0xf] %vm424_vm1, %v708_v13 }
 0x1d2   : > { %725 = vrot.lane.b32.xlu0 %v1570_v50, %s1307_s7  ;;  %727 = vrot.lane.b32.xlu1 %v1593_v57, %s1307_s7 }
 0x1d4   : > { %v458_v14 = vpop.permute.xlu0 %457  ;;  %v724_v15 = vpop.permute.xlu1 %723 }
 0x1d5   : > { %953 = vst.msk [vmem:[%s1529_s19 + $0x60] sm:$0xf] %vm424_vm1, %v458_v14  ;;  %1020 = vst.msk [vmem:[%s1529_s19 + $0x16c] sm:$0xf] %vm424_vm1, %v724_v15 }
 0x1d6   : > { %729 = vrot.lane.b32.xlu0 %v1566_v46, %s1307_s7  ;;  %731 = vrot.lane.b32.xlu1 %v1583_v54, %s1307_s7 }
 0x1d8   : > { %v507_v16 = vpop.permute.xlu0 %506  ;;  %v460_v17 = vpop.permute.xlu1 %459 }
 0x1d9   : > { %961 = vst.msk [vmem:[%s1529_s19 + $0x80] sm:$0xf] %vm424_vm1, %v507_v16  ;;  %954 = vst.msk [vmem:[%s1529_s19 + $0x64] sm:$0xf] %vm424_vm1, %v460_v17 }
 0x1dc   : > { %v523_v18 = vpop.permute.xlu0 %522  ;;  %v509_v19 = vpop.permute.xlu1 %508 }
 0x1dd   : > { %969 = vst.msk [vmem:[%s1529_s19 + $0xa0] sm:$0xf] %vm424_vm1, %v523_v18  ;;  %962 = vst.msk [vmem:[%s1529_s19 + $0x84] sm:$0xf] %vm424_vm1, %v509_v19 }
 0x1e0   : > { %v572_v20 = vpop.permute.xlu0 %571  ;;  %v525_v21 = vpop.permute.xlu1 %524 }
 0x1e1   : > { %977 = vst.msk [vmem:[%s1529_s19 + $0xc0] sm:$0xf] %vm424_vm1, %v572_v20  ;;  %970 = vst.msk [vmem:[%s1529_s19 + $0xa4] sm:$0xf] %vm424_vm1, %v525_v21 }
 0x1e4   : > { %v588_v22 = vpop.permute.xlu0 %587  ;;  %v574_v23 = vpop.permute.xlu1 %573 }
 0x1e5   : > { %985 = vst.msk [vmem:[%s1529_s19 + $0xe0] sm:$0xf] %vm424_vm1, %v588_v22  ;;  %978 = vst.msk [vmem:[%s1529_s19 + $0xc4] sm:$0xf] %vm424_vm1, %v574_v23 }
 0x1e8   : > { %v637_v24 = vpop.permute.xlu0 %636  ;;  %v590_v25 = vpop.permute.xlu1 %589 }
 0x1e9   : > { %993 = vst.msk [vmem:[%s1529_s19 + $0x100] sm:$0xf] %vm424_vm1, %v637_v24  ;;  %986 = vst.msk [vmem:[%s1529_s19 + $0xe4] sm:$0xf] %vm424_vm1, %v590_v25 }
 0x1ec   : > { %v653_v26 = vpop.permute.xlu0 %652  ;;  %v639_v27 = vpop.permute.xlu1 %638 }
 0x1ed   : > { %1001 = vst.msk [vmem:[%s1529_s19 + $0x120] sm:$0xf] %vm424_vm1, %v653_v26  ;;  %994 = vst.msk [vmem:[%s1529_s19 + $0x104] sm:$0xf] %vm424_vm1, %v639_v27 }
 0x1f0   : > { %v702_v28 = vpop.permute.xlu0 %701  ;;  %v655_v29 = vpop.permute.xlu1 %654 }
 0x1f1   : > { %1009 = vst.msk [vmem:[%s1529_s19 + $0x140] sm:$0xf] %vm424_vm1, %v702_v28  ;;  %1002 = vst.msk [vmem:[%s1529_s19 + $0x124] sm:$0xf] %vm424_vm1, %v655_v29 }
 0x1f4   : > { %v718_v30 = vpop.permute.xlu0 %717  ;;  %v704_v31 = vpop.permute.xlu1 %703 }
 0x1f5   : > { %1017 = vst.msk [vmem:[%s1529_s19 + $0x160] sm:$0xf] %vm424_vm1, %v718_v30  ;;  %1010 = vst.msk [vmem:[%s1529_s19 + $0x144] sm:$0xf] %vm424_vm1, %v704_v31 }
 0x1f8   : > { %v720_v32 = vpop.permute.xlu1 %719  ;;  %v444_v33 = vpop.permute.xlu0 %443 }
 0x1f9   : > { %1018 = vst.msk [vmem:[%s1529_s19 + $0x164] sm:$0xf] %vm424_vm1, %v720_v32  ;;  %946 = vst.msk [vmem:[%s1529_s19 + $0x44] sm:$0xf] %vm424_vm1, %v444_v33 }
 0x1fc   : > { %v454_v34 = vpop.permute.xlu0 %453  ;;  %v456_v35 = vpop.permute.xlu1 %455 }
 0x1fd   : > { %951 = vst.msk [vmem:[%s1529_s19 + $0x58] sm:$0xf] %vm424_vm1, %v454_v34  ;;  %952 = vst.msk [vmem:[%s1529_s19 + $0x5c] sm:$0xf] %vm424_vm1, %v456_v35 }
 0x200   : > { %v470_v36 = vpop.permute.xlu0 %469  ;;  %v472_v37 = vpop.permute.xlu1 %471 }
 0x201   : > { %959 = vst.msk [vmem:[%s1529_s19 + $0x78] sm:$0xf] %vm424_vm1, %v470_v36  ;;  %960 = vst.msk [vmem:[%s1529_s19 + $0x7c] sm:$0xf] %vm424_vm1, %v472_v37 }
 0x204   : > { %v519_v38 = vpop.permute.xlu0 %518  ;;  %v521_v39 = vpop.permute.xlu1 %520 }
 0x205   : > { %967 = vst.msk [vmem:[%s1529_s19 + $0x98] sm:$0xf] %vm424_vm1, %v519_v38  ;;  %968 = vst.msk [vmem:[%s1529_s19 + $0x9c] sm:$0xf] %vm424_vm1, %v521_v39 }
 0x208   : > { %v535_v40 = vpop.permute.xlu0 %534  ;;  %v537_v41 = vpop.permute.xlu1 %536 }
 0x209   : > { %975 = vst.msk [vmem:[%s1529_s19 + $0xb8] sm:$0xf] %vm424_vm1, %v535_v40  ;;  %976 = vst.msk [vmem:[%s1529_s19 + $0xbc] sm:$0xf] %vm424_vm1, %v537_v41 }
 0x20c   : > { %v584_v42 = vpop.permute.xlu0 %583  ;;  %v586_v43 = vpop.permute.xlu1 %585 }
 0x20d   : > { %983 = vst.msk [vmem:[%s1529_s19 + $0xd8] sm:$0xf] %vm424_vm1, %v584_v42  ;;  %984 = vst.msk [vmem:[%s1529_s19 + $0xdc] sm:$0xf] %vm424_vm1, %v586_v43 }
 0x210   : > { %v600_v44 = vpop.permute.xlu0 %599  ;;  %v602_v45 = vpop.permute.xlu1 %601 }
 0x211   : > { %991 = vst.msk [vmem:[%s1529_s19 + $0xf8] sm:$0xf] %vm424_vm1, %v600_v44  ;;  %992 = vst.msk [vmem:[%s1529_s19 + $0xfc] sm:$0xf] %vm424_vm1, %v602_v45 }
 0x214   : > { %v649_v46 = vpop.permute.xlu0 %648  ;;  %v651_v47 = vpop.permute.xlu1 %650 }
 0x215   : > { %999 = vst.msk [vmem:[%s1529_s19 + $0x118] sm:$0xf] %vm424_vm1, %v649_v46  ;;  %1000 = vst.msk [vmem:[%s1529_s19 + $0x11c] sm:$0xf] %vm424_vm1, %v651_v47 }
 0x218   : > { %v665_v48 = vpop.permute.xlu0 %664  ;;  %v667_v49 = vpop.permute.xlu1 %666 }
 0x219   : > { %1007 = vst.msk [vmem:[%s1529_s19 + $0x138] sm:$0xf] %vm424_vm1, %v665_v48  ;;  %1008 = vst.msk [vmem:[%s1529_s19 + $0x13c] sm:$0xf] %vm424_vm1, %v667_v49 }
 0x21c   : > { %v714_v50 = vpop.permute.xlu0 %713  ;;  %v716_v51 = vpop.permute.xlu1 %715 }
 0x21d   : > { %1015 = vst.msk [vmem:[%s1529_s19 + $0x158] sm:$0xf] %vm424_vm1, %v714_v50  ;;  %1016 = vst.msk [vmem:[%s1529_s19 + $0x15c] sm:$0xf] %vm424_vm1, %v716_v51 }
 0x220   : > { %v450_v52 = vpop.permute.xlu0 %449  ;;  %v452_v53 = vpop.permute.xlu1 %451 }
 0x221   : > { %949 = vst.msk [vmem:[%s1529_s19 + $0x50] sm:$0xf] %vm424_vm1, %v450_v52  ;;  %950 = vst.msk [vmem:[%s1529_s19 + $0x54] sm:$0xf] %vm424_vm1, %v452_v53 }
 0x224   : > { %v466_v54 = vpop.permute.xlu0 %465  ;;  %v468_v55 = vpop.permute.xlu1 %467 }
 0x225   : > { %957 = vst.msk [vmem:[%s1529_s19 + $0x70] sm:$0xf] %vm424_vm1, %v466_v54  ;;  %958 = vst.msk [vmem:[%s1529_s19 + $0x74] sm:$0xf] %vm424_vm1, %v468_v55 }
 0x228   : > { %v515_v56 = vpop.permute.xlu0 %514  ;;  %v517_v57 = vpop.permute.xlu1 %516 }
 0x229   : > { %965 = vst.msk [vmem:[%s1529_s19 + $0x90] sm:$0xf] %vm424_vm1, %v515_v56  ;;  %966 = vst.msk [vmem:[%s1529_s19 + $0x94] sm:$0xf] %vm424_vm1, %v517_v57 }
 0x22c   : > { %v531_v58 = vpop.permute.xlu0 %530  ;;  %v533_v59 = vpop.permute.xlu1 %532 }
 0x22d   : > { %973 = vst.msk [vmem:[%s1529_s19 + $0xb0] sm:$0xf] %vm424_vm1, %v531_v58  ;;  %974 = vst.msk [vmem:[%s1529_s19 + $0xb4] sm:$0xf] %vm424_vm1, %v533_v59 }
 0x230   : > { %v580_v60 = vpop.permute.xlu0 %579  ;;  %v582_v61 = vpop.permute.xlu1 %581 }
 0x231   : > { %981 = vst.msk [vmem:[%s1529_s19 + $0xd0] sm:$0xf] %vm424_vm1, %v580_v60  ;;  %982 = vst.msk [vmem:[%s1529_s19 + $0xd4] sm:$0xf] %vm424_vm1, %v582_v61 }
 0x234   : > { %v596_v62 = vpop.permute.xlu0 %595  ;;  %v598_v63 = vpop.permute.xlu1 %597 }
 0x235   : > { %989 = vst.msk [vmem:[%s1529_s19 + $0xf0] sm:$0xf] %vm424_vm1, %v596_v62  ;;  %990 = vst.msk [vmem:[%s1529_s19 + $0xf4] sm:$0xf] %vm424_vm1, %v598_v63 }
 0x238   : > { %v645_v0 = vpop.permute.xlu0 %644  ;;  %v647_v1 = vpop.permute.xlu1 %646 }
 0x239   : > { %997 = vst.msk [vmem:[%s1529_s19 + $0x110] sm:$0xf] %vm424_vm1, %v645_v0  ;;  %998 = vst.msk [vmem:[%s1529_s19 + $0x114] sm:$0xf] %vm424_vm1, %v647_v1 }
 0x23c   : > { %v661_v2 = vpop.permute.xlu0 %660  ;;  %v663_v3 = vpop.permute.xlu1 %662 }
 0x23d   : > { %1005 = vst.msk [vmem:[%s1529_s19 + $0x130] sm:$0xf] %vm424_vm1, %v661_v2  ;;  %1006 = vst.msk [vmem:[%s1529_s19 + $0x134] sm:$0xf] %vm424_vm1, %v663_v3 }
 0x240   : > { %v710_v4 = vpop.permute.xlu0 %709  ;;  %v712_v5 = vpop.permute.xlu1 %711 }
 0x241   : > { %1013 = vst.msk [vmem:[%s1529_s19 + $0x150] sm:$0xf] %vm424_vm1, %v710_v4  ;;  %1014 = vst.msk [vmem:[%s1529_s19 + $0x154] sm:$0xf] %vm424_vm1, %v712_v5 }
 0x244   : > { %v726_v6 = vpop.permute.xlu0 %725  ;;  %v728_v7 = vpop.permute.xlu1 %727 }
 0x245   : > { %1021 = vst.msk [vmem:[%s1529_s19 + $0x170] sm:$0xf] %vm424_vm1, %v726_v6  ;;  %1022 = vst.msk [vmem:[%s1529_s19 + $0x174] sm:$0xf] %vm424_vm1, %v728_v7 }
 0x248   : > { %v730_v8 = vpop.permute.xlu0 %729  ;;  %v732_v9 = vpop.permute.xlu1 %731 }
 0x249   : > { %1023 = vst.msk [vmem:[%s1529_s19 + $0x178] sm:$0xf] %vm424_vm1, %v730_v8  ;;  %1024 = vst.msk [vmem:[%s1529_s19 + $0x17c] sm:$0xf] %vm424_vm1, %v732_v9 }
 0x24a   : > { %s1046_s23 = sshll.u32 %s1287_s12, 10  ;;  %s798_s29 = sshll.u32 %s1529_s19, 4  ;;  %s799_s29 = int_to_ptr.vmem [resolvable:$true] %s798_s29 }
 0x24b   : > { %s781_s18 = scalar_lea.hbm %s1952_s2, %s1046_s23  ;;  %s1308_s8 = smov 1024  }
 0x24c   : > { %1088 = sst [smem:[#allocation9]] (%p1426_p10), %s1308_s8  ;;  %s1309_s15 = smov 2048  }
 0x24d   : > { %1089 = sst [smem:[#allocation9 + $0x1]] (%p1426_p10), %s1309_s15  ;;  %s1310_s16 = smov 16  }
 0x24e   : > { %1090 = sst [smem:[#allocation9 + $0x2]] (%p1426_p10), %s1310_s16  ;;  %s1311_s22 = smov 64  }
 0x24f   : > { %1091 = sst [smem:[#allocation9 + $0x3]] (%p1426_p10), %s1311_s22  ;;  %s1312_s12 = smov 4  }
 0x250   : > { %1092 = sst [smem:[#allocation9 + $0x4]] (%p1426_p10), %s1311_s22  ;;  %s1313_s24 = smov [#allocation8]  }
 0x251   : > { %1093 = sst [smem:[#allocation9 + $0x5]] (%p1426_p10), %s1312_s12  ;;  %s1314_s17 = smov 0  }
 0x252   : > { %1094 = dma.general (%p1426_p10), %s799_s29, 6144, %s781_s18, %s767_s27, %s1313_s24, [#allocation9], %s1314_s17, 0  }
 0x253 PF: > { %s826_s19 = sand.u32 1, %s1275_s9   ;;  %p1970_p4 = scmp.ne.s32.totalorder %s1960_s20, 0 }
 0x254   : > { %p1971_p6 = scmp.ge.s32.totalorder %s1295_s14, 2  ;;  %s827_s21 = scalar_lea.sflag [#allocation4], %s826_s19 }
 0x256   : > { %p1105_p8 = pnand %p1971_p6, %p1970_p4 }
 0x258   : > { %1270 = dma.done.wait (!%p1105_p8), %s827_s21, 6144  }
 0x259   : > { %1272 = vsyncadd (!%p1105_p8), %s827_s21, 4294961152  ;;  %s19_s14 = sadd.s32 1, %s1295_s14   ;;  %s1972_s9 = smov %s1279_s10 }
 0x25a   : > { %p16_p12 = scmp.ge.s32.totalorder %s19_s14, 4   ;;  %s1973_s10 = smov %s1283_s11 }
 0x25b   : > { %s1974_s11 = smov %s1435_s28  ;;  %s1975_s12 = smov %s1291_s13 }
 0x25c   : > { %s1976_s13 = smov %s1978_s25  ;;  %18 = sbr.rel (!%p16_p12) target bundleno = 7 (0x7), region = 87 }
 0x263   :  { %832 = vsyncpa [#allocation3], 1 }
 0x264   :  { %834 = vsyncpa [#allocation3 + $0x1], 1 }
 0x265   :  { %835 = vsyncpa [#allocation6], 1 }
 0x266   :  { %836 = vsyncpa [#allocation4], 1 }
 0x267   :  { %838 = vsyncpa [#allocation4 + $0x1], 1 }

</bundles_post_ra>
